<compile_context>
chip_gen: v7x
topology: tpu7x:2x2x1
jax: 0.10.0
libtpu: 0.0.40
codegen_flags: <defaults>
</compile_context>

<pallas_src>
import functools

import jax
import jax.numpy as jnp
import numpy as np
from jax.experimental import pallas as pl
from jax.experimental.pallas import tpu as pltpu


def _round_up(x: int, m: int) -> int:
    return ((x + m - 1) // m) * m


def _conv_bn_relu6_kernel(x_ref, w_ref, scale_ref, shift_ref, o_ref, *,
                          kh_n, stride, wo, l_phase):
    # x_ref:     (1, P*L, KW*C_in) bf16  phase-split, KW-folded, flattened image
    # w_ref:     (KH, KW*C_in, tn) bf16  conv weights (no BN folded in)
    # scale_ref: (1, tn)           f32   gamma / sqrt(var + eps)
    # shift_ref: (1, tn)           f32   (bias - mean) * scale + beta
    # o_ref:     (1, tm, tn)       bf16  output tile (flat over Ho*Wo)
    tm = o_ref.shape[1]
    i = pl.program_id(2)                    # M-tile index
    base = pl.multiple_of(i * tm, tm)       # tile-aligned dynamic offset

    acc = None
    for kh in range(kh_n):                  # KH unrolled dots, K = KW*C_in
        p = kh % stride                     # row phase (static)
        off = p * l_phase + (kh // stride) * wo
        lhs = x_ref[0, pl.ds(base + off, tm), :]
        d = jnp.dot(lhs, w_ref[kh], preferred_element_type=jnp.float32)
        acc = d if acc is None else acc + d

    y = acc * scale_ref[...] + shift_ref[...]        # BN(eval) epilogue, f32
    o_ref[0] = jnp.clip(y, 0.0, 6.0).astype(o_ref.dtype)   # ReLU6, bf16 out


def conv_bn_act_nhwc(x_nhwc, weight, bias, gamma, beta, running_mean,
                     running_var, *, stride: int = 1, eps: float = 1e-5,
                     tm: int = None, tn: int = None):
    """Fused Conv2d(groups=1, padding=(k-1)//2) + BN(eval) + ReLU6, NHWC in/out."""
    # TODO(synk): groups > 1 (grouped / depthwise conv) not implemented.
    N, H, W, C_in = x_nhwc.shape
    C_out, C_in_w, KH, KW = weight.shape
    assert C_in_w == C_in, "only groups=1 is supported"
    # NOTE: padding=(k-1)//2 matches PyTorch only for odd kernel sizes.
    pad = (KH - 1) // 2
    s = int(stride)
    Hp, Wp = H + 2 * pad, W + 2 * pad
    Ho = (Hp - KH) // s + 1
    Wo = (Wp - KW) // s + 1
    KWC = KW * C_in

    # Tile sizes: wide tn fills the 256-wide MXU on v6e/v7x when C_out allows.
    if tn is None:
        tn = 256 if C_out >= 256 else 128
    if tm is None:
        tm = 128 if tn >= 256 else 256

    # ---------------- host-side prep (cheap, no full im2col) ----------------
    xp = jnp.pad(x_nhwc, ((0, 0), (pad, pad), (pad, pad), (0, 0)))
    xp = xp.astype(jnp.bfloat16)
    # fold KW into channels: x2[n,h,w,kw*C+c] = xp[n,h,w+kw,c]
    cols = Wp - KW + 1
    x2 = jnp.concatenate([xp[:, :, kw:kw + cols, :] for kw in range(KW)],
                         axis=-1)                      # (N, Hp, cols, KWC)
    # column subsample by stride -> only the Wo needed output columns
    x2 = x2[:, :, ::s, :][:, :, :Wo, :]                # (N, Hp, Wo, KWC)

    # row-phase split (p = row % s) so all in-kernel loads are unit-stride
    P = min(s, KH)                                     # phases actually used
    Hpp = Ho + (KH - 1) // s                           # rows needed per phase
    M_out = Ho * Wo
    M_pad = _round_up(M_out, tm)
    L_req = max(Hpp * Wo, M_pad + ((KH - 1) // s) * Wo)   # in-bounds slack
    phases = []
    for p in range(P):
        xph = x2[:, p::s, :, :][:, :Hpp]               # (N, <=Hpp, Wo, KWC)
        xph = xph.reshape(N, -1, KWC)
        xph = jnp.pad(xph, ((0, 0), (0, L_req - xph.shape[1]), (0, 0)))
        phases.append(xph)
    x3 = jnp.concatenate(phases, axis=1) if P > 1 else phases[0]
    L_total = x3.shape[1]                              # = P * L_req

    # weights -> (KH, KW*C_in, Cp) bf16 ; BN scale/shift stay f32 (epilogue)
    Cp = _round_up(C_out, tn)
    w = jnp.transpose(weight, (2, 3, 1, 0)).reshape(KH, KWC, C_out)
    w = jnp.pad(w, ((0, 0), (0, 0), (0, Cp - C_out))).astype(jnp.bfloat16)
    scale = gamma / jnp.sqrt(running_var + eps)
    shift = (bias - running_mean) * scale + beta
    scale = jnp.pad(scale, (0, Cp - C_out)).reshape(1, Cp).astype(jnp.float32)
    shift = jnp.pad(shift, (0, Cp - C_out)).reshape(1, Cp).astype(jnp.float32)

    # ---------------------------- pallas_call -------------------------------
    kernel = functools.partial(_conv_bn_relu6_kernel, kh_n=KH, stride=s,
                               wo=Wo, l_phase=L_req)

    # single-buffer the whole-image block when it is large (bounds VMEM on v7x;
    # its index_map only changes with n, so the exposed DMA is once per image)
    x_block_bytes = L_total * _round_up(KWC, 128) * 2
    if x_block_bytes > 8 * 1024 * 1024:
        x_spec = pl.BlockSpec((1, L_total, KWC), lambda n, j, i: (n, 0, 0),
                              pipeline_mode=pl.Buffered(1))
    else:
        x_spec = pl.BlockSpec((1, L_total, KWC), lambda n, j, i: (n, 0, 0))

    try:
        phys_vmem = pltpu.get_tpu_info().vmem_capacity_bytes
    except Exception:
        phys_vmem = 64 * 1024 * 1024
    vmem_limit = int(min(100 * 1024 * 1024, (phys_vmem * 3) // 4))

    flops = 2 * N * M_pad * Cp * KH * KWC
    bytes_accessed = (x3.size * 2 + w.size * 2 + (scale.size + shift.size) * 4
                      + N * M_pad * Cp * 2)

    out = pl.pallas_call(
        kernel,
        out_shape=jax.ShapeDtypeStruct((N, M_pad, Cp), jnp.bfloat16),
        grid_spec=pltpu.PrefetchScalarGridSpec(
            num_scalar_prefetch=0,
            grid=(N, Cp // tn, M_pad // tm),        # M innermost: x / w reuse
            in_specs=[
                x_spec,
                pl.BlockSpec((KH, KWC, tn), lambda n, j, i: (0, 0, j)),
                pl.BlockSpec((1, tn), lambda n, j, i: (0, j)),
                pl.BlockSpec((1, tn), lambda n, j, i: (0, j)),
            ],
            out_specs=pl.BlockSpec((1, tm, tn), lambda n, j, i: (n, i, j)),
        ),
        compiler_params=pltpu.CompilerParams(
            dimension_semantics=("parallel", "parallel", "parallel"),
            vmem_limit_bytes=vmem_limit),
        cost_estimate=pl.CostEstimate(flops=flops, transcendentals=0,
                                      bytes_accessed=bytes_accessed),
    )(x3, w, scale, shift)

    # drop M padding and channel padding, unflatten spatial dims
    out = out[:, :M_out, :C_out].reshape(N, Ho, Wo, C_out)
    return out                                               # NHWC, bf16


def conv_bn_act(x_nchw, weight, bias, gamma, beta, running_mean, running_var,
                stride: int = 1, eps: float = 1e-5):
    """NCHW (PyTorch-convention) boundary wrapper.

    In a full model, keep activations NHWC between layers and call
    conv_bn_act_nhwc directly to avoid the per-layer transposes.
    """
    x = jnp.transpose(x_nchw, (0, 2, 3, 1))
    y = conv_bn_act_nhwc(x, weight, bias, gamma, beta, running_mean,
                         running_var, stride=stride, eps=eps)
    return jnp.transpose(y, (0, 3, 1, 2))


def _reference(x, weight, bias, gamma, beta, mean, var, stride=1, eps=1e-5):
    pad = (weight.shape[2] - 1) // 2
    y = jax.lax.conv_general_dilated(
        x, weight, (stride, stride), [(pad, pad), (pad, pad)],
        dimension_numbers=("NCHW", "OIHW", "NCHW"))
    y = y + bias[None, :, None, None]
    y = (y - mean[None, :, None, None]) / jnp.sqrt(var + eps)[None, :, None, None]
    y = y * gamma[None, :, None, None] + beta[None, :, None, None]
    return jnp.clip(y, 0.0, 6.0)


if __name__ == "__main__":
    key = jax.random.PRNGKey(0)
    k_x, k_w, k_b, k_g, k_bt, k_m, k_v = jax.random.split(key, 7)

    # small shapes consistent with the module: N=2, C_in=4, C_out=8, 16x16, k=3
    N, C_in, C_out, H, W, K = 2, 4, 8, 16, 16, 3

    x = jax.random.normal(k_x, (N, C_in, H, W), jnp.float32)
    weight = jax.random.normal(k_w, (C_out, C_in, K, K), jnp.float32) * 0.1
    bias = jax.random.normal(k_b, (C_out,), jnp.float32) * 0.1
    gamma = jax.random.normal(k_g, (C_out,), jnp.float32) * 0.1 + 1.0
    beta = jax.random.normal(k_bt, (C_out,), jnp.float32) * 0.1
    running_mean = jax.random.normal(k_m, (C_out,), jnp.float32) * 0.1
    running_var = jax.random.uniform(k_v, (C_out,), jnp.float32, 0.5, 1.5)

    for stride in (1, 2):
        out = conv_bn_act(x, weight, bias, gamma, beta, running_mean,
                          running_var, stride=stride)
        out = jax.block_until_ready(out)
        ref = _reference(x, weight, bias, gamma, beta, running_mean,
                         running_var, stride=stride)
        # bf16 MXU inputs / bf16 output (f32 accumulation) -> relaxed tolerance
        out_np = np.asarray(out).astype(np.float32)
        np.testing.assert_allclose(out_np, np.asarray(ref),
                                   rtol=3e-2, atol=3e-2)
    print("KERNEL_OK")
</pallas_src>

<mosaic_0001>
module attributes {stable_mosaic.version = 11 : i64} {
  func.func @_conv_bn_relu6_kernel(%arg0: i32, %arg1: i32, %arg2: i32, %arg3: memref<1x288x12xbf16, #tpu.memory_space<vmem>>, %arg4: memref<3x12x128xbf16, #tpu.memory_space<vmem>>, %arg5: memref<1x128xf32, #tpu.memory_space<vmem>>, %arg6: memref<1x128xf32, #tpu.memory_space<vmem>>, %arg7: memref<1x256x128xbf16, #tpu.memory_space<vmem>>) attributes {dimension_semantics = [#tpu.dimension_semantics<parallel>, #tpu.dimension_semantics<parallel>, #tpu.dimension_semantics<parallel>], iteration_bounds = array<i64: 2, 1, 1>, scalar_prefetch = 0 : i64, scratch_operands = 0 : i64, tpu.core_type = #tpu.core_type<tc>, window_params = [{transform_indices = @transform_0, window_bounds = array<i64: 1, 288, 12>}, {transform_indices = @transform_1, window_bounds = array<i64: 3, 12, 128>}, {transform_indices = @transform_2, window_bounds = array<i64: 1, 128>}, {transform_indices = @transform_3, window_bounds = array<i64: 1, 128>}, {transform_indices = @transform_4, window_bounds = array<i64: 1, 256, 128>}]} {
    %c256_i32 = arith.constant 256 : i32
    %0 = arith.muli %arg2, %c256_i32 : i32
    %1 = tpu.assume_multiple %0, 256 : i32
    %c0_i32 = arith.constant 0 : i32
    %2 = arith.addi %1, %c0_i32 : i32
    %c0 = arith.constant 0 : index
    %3 = arith.index_cast %2 : i32 to index
    %c0_0 = arith.constant 0 : index
    %4 = vector.load %arg3[%c0, %3, %c0_0] : memref<1x288x12xbf16, #tpu.memory_space<vmem>>, vector<1x256x12xbf16>
    %5 = vector.shape_cast %4 : vector<1x256x12xbf16> to vector<256x12xbf16>
    %c0_1 = arith.constant 0 : index
    %c0_2 = arith.constant 0 : index
    %c0_3 = arith.constant 0 : index
    %6 = vector.load %arg4[%c0_1, %c0_2, %c0_3] : memref<3x12x128xbf16, #tpu.memory_space<vmem>>, vector<1x12x128xbf16>
    %7 = vector.shape_cast %6 : vector<1x12x128xbf16> to vector<12x128xbf16>
    %cst = arith.constant dense<0.000000e+00> : vector<256x128xf32>
    %8 = tpu.matmul %5, %7, %cst {dimension_numbers = #tpu.dot_dimension_numbers<[1], [0], [0], [1], [0, 0, 1, 1], [], []>} : vector<256x12xbf16>, vector<12x128xbf16>, vector<256x128xf32> -> vector<256x128xf32>
    %c16_i32 = arith.constant 16 : i32
    %9 = arith.addi %1, %c16_i32 : i32
    %c0_4 = arith.constant 0 : index
    %10 = arith.index_cast %9 : i32 to index
    %c0_5 = arith.constant 0 : index
    %11 = vector.load %arg3[%c0_4, %10, %c0_5] : memref<1x288x12xbf16, #tpu.memory_space<vmem>>, vector<1x256x12xbf16>
    %12 = vector.shape_cast %11 : vector<1x256x12xbf16> to vector<256x12xbf16>
    %c1 = arith.constant 1 : index
    %c0_6 = arith.constant 0 : index
    %c0_7 = arith.constant 0 : index
    %13 = vector.load %arg4[%c1, %c0_6, %c0_7] : memref<3x12x128xbf16, #tpu.memory_space<vmem>>, vector<1x12x128xbf16>
    %14 = vector.shape_cast %13 : vector<1x12x128xbf16> to vector<12x128xbf16>
    %cst_8 = arith.constant dense<0.000000e+00> : vector<256x128xf32>
    %15 = tpu.matmul %12, %14, %cst_8 {dimension_numbers = #tpu.dot_dimension_numbers<[1], [0], [0], [1], [0, 0, 1, 1], [], []>} : vector<256x12xbf16>, vector<12x128xbf16>, vector<256x128xf32> -> vector<256x128xf32>
    %16 = arith.addf %8, %15 : vector<256x128xf32>
    %c32_i32 = arith.constant 32 : i32
    %17 = arith.addi %1, %c32_i32 : i32
    %c0_9 = arith.constant 0 : index
    %18 = arith.index_cast %17 : i32 to index
    %c0_10 = arith.constant 0 : index
    %19 = vector.load %arg3[%c0_9, %18, %c0_10] : memref<1x288x12xbf16, #tpu.memory_space<vmem>>, vector<1x256x12xbf16>
    %20 = vector.shape_cast %19 : vector<1x256x12xbf16> to vector<256x12xbf16>
    %c2 = arith.constant 2 : index
    %c0_11 = arith.constant 0 : index
    %c0_12 = arith.constant 0 : index
    %21 = vector.load %arg4[%c2, %c0_11, %c0_12] : memref<3x12x128xbf16, #tpu.memory_space<vmem>>, vector<1x12x128xbf16>
    %22 = vector.shape_cast %21 : vector<1x12x128xbf16> to vector<12x128xbf16>
    %cst_13 = arith.constant dense<0.000000e+00> : vector<256x128xf32>
    %23 = tpu.matmul %20, %22, %cst_13 {dimension_numbers = #tpu.dot_dimension_numbers<[1], [0], [0], [1], [0, 0, 1, 1], [], []>} : vector<256x12xbf16>, vector<12x128xbf16>, vector<256x128xf32> -> vector<256x128xf32>
    %24 = arith.addf %16, %23 : vector<256x128xf32>
    %c0_14 = arith.constant 0 : index
    %c0_15 = arith.constant 0 : index
    %25 = vector.load %arg5[%c0_14, %c0_15] : memref<1x128xf32, #tpu.memory_space<vmem>>, vector<1x128xf32>
    %26 = vector.broadcast %25 : vector<1x128xf32> to vector<256x128xf32>
    %27 = arith.mulf %24, %26 : vector<256x128xf32>
    %c0_16 = arith.constant 0 : index
    %c0_17 = arith.constant 0 : index
    %28 = vector.load %arg6[%c0_16, %c0_17] : memref<1x128xf32, #tpu.memory_space<vmem>>, vector<1x128xf32>
    %29 = vector.broadcast %28 : vector<1x128xf32> to vector<256x128xf32>
    %30 = arith.addf %27, %29 : vector<256x128xf32>
    %cst_18 = arith.constant 0.000000e+00 : f32
    %cst_19 = arith.constant 6.000000e+00 : f32
    %31 = vector.broadcast %cst_18 : f32 to vector<256x128xf32>
    %32 = arith.maximumf %31, %30 : vector<256x128xf32>
    %33 = vector.broadcast %cst_19 : f32 to vector<256x128xf32>
    %34 = arith.minimumf %33, %32 : vector<256x128xf32>
    %35 = arith.truncf %34 : vector<256x128xf32> to vector<256x128xbf16>
    %c0_20 = arith.constant 0 : index
    %c0_21 = arith.constant 0 : index
    %c0_22 = arith.constant 0 : index
    %36 = vector.load %arg7[%c0_20, %c0_21, %c0_22] : memref<1x256x128xbf16, #tpu.memory_space<vmem>>, vector<1x256x128xbf16>
    %37 = vector.shape_cast %36 : vector<1x256x128xbf16> to vector<256x128xbf16>
    %38 = vector.shape_cast %35 : vector<256x128xbf16> to vector<1x256x128xbf16>
    tpu.vector_store %arg7[%c0_20, %c0_21, %c0_22], %38 {strides = array<i32>} : memref<1x256x128xbf16, #tpu.memory_space<vmem>>, vector<1x256x128xbf16>,
    return
  }
  func.func @transform_0(%arg0: i32, %arg1: i32, %arg2: i32) -> (i32, i32, i32) {
    %c0_i32 = arith.constant 0 : i32
    %c0_i32_0 = arith.constant 0 : i32
    %c0_i32_1 = arith.constant 0 : i32
    return %arg0, %c0_i32, %c0_i32_0 : i32, i32, i32
  }
  func.func @transform_1(%arg0: i32, %arg1: i32, %arg2: i32) -> (i32, i32, i32) {
    %c0_i32 = arith.constant 0 : i32
    %c0_i32_0 = arith.constant 0 : i32
    %c0_i32_1 = arith.constant 0 : i32
    return %c0_i32, %c0_i32_0, %arg1 : i32, i32, i32
  }
  func.func @transform_2(%arg0: i32, %arg1: i32, %arg2: i32) -> (i32, i32) {
    %c0_i32 = arith.constant 0 : i32
    %c0_i32_0 = arith.constant 0 : i32
    return %c0_i32, %arg1 : i32, i32
  }
  func.func @transform_3(%arg0: i32, %arg1: i32, %arg2: i32) -> (i32, i32) {
    %c0_i32 = arith.constant 0 : i32
    %c0_i32_0 = arith.constant 0 : i32
    return %c0_i32, %arg1 : i32, i32
  }
  func.func @transform_4(%arg0: i32, %arg1: i32, %arg2: i32) -> (i32, i32, i32) {
    %c0_i32 = arith.constant 0 : i32
    return %arg0, %arg2, %arg1 : i32, i32, i32
  }
}

</mosaic_0001>

<bundles_post_ra>
// kernel: tpu_custom_call.1
= control target key start
LH: loop header
LB: loop body
LE: loop exit
PB: predicated region body
PF: predicated region fallthrough
CT: control target
= control target key end

     0   :  { %9 = vsyncpa [#allocation3], 0  ;;  %s2882_s0 = inlined_call_operand.vmem [shape: bf16[2,288,12], index: 0, kind: input, shape index: {}]   ;;  %s2883_s1 = inlined_call_operand.vmem [shape: bf16[3,12,128], index: 1, kind: input, shape index: {}]   ;;  %s2884_s2 = inlined_call_operand.vmem [shape: f32[1,128], index: 2, kind: input, shape index: {}]   ;;  %s2885_s3 = inlined_call_operand.vmem [shape: f32[1,128], index: 3, kind: input, shape index: {}]   ;;  %s2886_s4 = inlined_call_operand.hbm [shape: bf16[2,256,128], index: 4, kind: output, shape index: {}]  }
   0x1   :  { %11 = vsyncpa [#allocation3 + $0x1], 0  ;;  %s2535_s15 = smov 0   ;;  %s2537_s16 = smov 0  }
   0x2   :  { %s2539_s17 = smov 0   ;;  %s2541_s18 = smov 0  }
   0x3   :  { %s2543_s19 = smov 0   ;;  %s2545_s20 = smov 0  }
   0x4 LB: > { %s1751_s21 = sadd.s32 4294967295, %s2505_s20   ;;  %s1752_s22 = sadd.s32 4294967294, %s2505_s20   ;;  %s2505_s20 = sphi %s2545_s20, %s17_s20   ;;  %s2501_s19 = sphi %s2543_s19, %s2893_s19   ;;  %s2497_s18 = sphi %s2541_s18, %s2892_s18   ;;  %s2493_s17 = sphi %s2539_s17, %s2891_s17   ;;  %s2489_s16 = sphi %s2537_s16, %s2890_s16   ;;  %s2485_s15 = sphi %s2535_s15, %s2889_s15  }
   0x5   : > { %s36_s23 = sadd.s32 1, %s2501_s19  ;;  %s151_s24 = sadd.s32 1, %s2493_s17 }
   0x6   : > { %p38_p0 = scmp.ge.s32.totalorder %s36_s23, 2  ;;  %p161_p1 = scmp.ne.s32.totalorder %s2493_s17, %s2489_s16 }
   0x7   : > { %p162_p2 = scmp.eq.s32.totalorder %s1751_s21, 1  ;;  %p167_p3 = scmp.ne.s32.totalorder %s2489_s16, %s2485_s15 }
   0x8   : > { %s2895_s23 = smov (%p38_p0, %s36_s23), 0  ;;  %p168_p5 = scmp.eq.s32.totalorder %s1752_s22, 1 }
   0x9   : > { %p2575_p4 = por %p162_p2, %p161_p1  ;;  %s144_s26 = ssub.s32 %s2501_s19, %s2895_s23 }
   0xa   : > { %p1758_p6 = scmp.ge.s32.totalorder %s2505_s20, 1  ;;  %p149_p7 = scmp.eq.s32.totalorder %s144_s26, 0 }
   0xb   : > { %p2582_p8 = por %p168_p5, %p167_p3  ;;  %p213_p9 = scmp.lt.s32.totalorder %s2505_s20, 3 }
   0xc   : > { %s2588_s28 = scalar_select %p149_p7, %s2493_s17, %s151_s24  }
   0xd   : > { %p214_p10 = pnand %p1758_p6, %p213_p9 }
   0xe   : > { %v2376_v0 = vld [vmem:[%s2883_s1 + $0x8] sm:$0x3f] (!%p214_p10)   ;;  %vm479_vm0 = vcmask (!%p214_p10), 1045504   ;;  %p249_p11 = scmp.lt.s32.totalorder (!%p214_p10), %s2497_s18, 1  ;;  %v2377_v1 = vld [vmem:[%s2883_s1] sm:$0x3f] (!%p214_p10)  }
   0xf   : > { %217 = sbr.rel (%p214_p10) target bundleno = 359 (0x167), region = 36  ;;  %2314 = vmatprep.subr.msk.bf16.mxu1 (!%p214_p10), %vm479_vm0, %v2376_v0  ;;  %v481_v2 = vsel (!%p214_p10), %vm479_vm0, %v2376_v0, 0  ;;  %v2380_v3 = vld [vmem:[%s2883_s1 + $0x10] sm:$0x3f] (!%p214_p10)   ;;  %2315 = vmatprep.subr.msk.bf16.mxu0 (!%p214_p10), %vm479_vm0, %v2377_v1  ;;  %v778_v4 = vsel (!%p214_p10), %vm479_vm0, %v2377_v1, 0  ;;  %vm430_vm1 = vcmask (!%p214_p10), 97280  }
  0x10   : > { %2147 = vmatpush3.bf16.msra.mxu1 (!%p214_p10), %v481_v2  ;;  %2181 = vmatpush3.bf16.msra.mxu0 (!%p214_p10), %v778_v4  ;;  %v1115_v9 = vsel (!%p214_p10), %vm479_vm0, %v2380_v3, 0  ;;  %s246_s26 = sand.u32 (!%p214_p10), 1, %s2489_s16   ;;  %s1999_s5 = sshll.u32 (!%p214_p10), %s2497_s18, 11 }
  0x11   : > { %2316 = vmatprep.subr.msk.bf16.mxu1 (!%p214_p10), %vm479_vm0, %v2377_v1  ;;  %2317 = vmatprep.subr.msk.bf16.mxu0 (!%p214_p10), %vm479_vm0, %v2380_v3  ;;  %s1759_s29 = sshll.u32 (!%p214_p10), %s246_s26, 7  ;;  %s2828_s9 = scalar_lea.hbm (!%p214_p10), %s2886_s4, %s1999_s5 }
  0x12   : > { %s2750_s30 = scalar_lea.vmem (!%p214_p10), [#allocation2], %s1759_s29  ;;  %s2507_s11 = smov (!%p214_p10), [#allocation2]  }
  0x13   : > { %s1629_s6 = sshll.u32 (!%p214_p10), %s2750_s30, 4  ;;  %s2431_s12 = sshll.u32 (!%p214_p10), %s2507_s11, 4  ;;  %s2830_s6 = int_to_ptr.vmem [resolvable:$true] %s1629_s6  ;;  %s2432_s12 = int_to_ptr.vmem [resolvable:$false] %s2431_s12 }
  0x14   : > { %p2434_p1 = scmp.lt.s32.totalorder (!%p214_p10), %s2830_s6, %s2432_s12 }
  0x16   : > { %s250_s7 = scalar_select %p249_p11, %s2497_s18, 1 }
  0x17   : > { %s2836_s18 = scalar_lea.sflag [#allocation3], %s246_s26 }
  0x18   : > { %s2318_s10 = smul.u32 144, %s250_s7 }
  0x1a   : > { %s2610_s13 = scalar_lea.vmem %s2882_s0, %s2318_s10  ;;  %s2427_s10 = scalar_lea.vmem %s2830_s6, 2048 }
  0x1b   : > { %v2378_v5 = vld [vmem:[%s2610_s13 + $0x8] sm:$0xff]   ;;  %v2379_v6 = vld [vmem:[%s2610_s13] sm:$0xff]   ;;  %v2381_v7 = vld [vmem:[%s2610_s13 + $0x10] sm:$0xff]   ;;  %p2428_p12 = scmp.ne.s32.totalorder %s2830_s6, %s2427_s10 }
  0x1c   : > { %2148 = vmatprep.mubr.msk.bf16.mxu1 %vm430_vm1, %v2378_v5  ;;  %2182 = vmatprep.mubr.msk.bf16.mxu0 %vm430_vm1, %v2379_v6  ;;  %v2382_v8 = vld [vmem:[%s2610_s13 + $0x8] sm:$0xff]   ;;  %v2383_v10 = vld [vmem:[%s2610_s13 + $0x18] sm:$0xff]   ;;  %v2384_v11 = vld [vmem:[%s2610_s13 + $0x10] sm:$0xff]  }
  0x1d   : > { %2149 = vmatmul.mubr.msk.bf16.vlgmr.msra.gmra.mrb[0].mxu1 %vm430_vm1, %v2381_v7  ;;  %2183 = vmatmul.mubr.msk.bf16.vlgmr.msra.gmra.mrb[0].mxu0 %vm430_vm1, %v2382_v8  ;;  %v2385_v12 = vld [vmem:[%s2610_s13 + $0x20] sm:$0xff]   ;;  %v2386_v13 = vld [vmem:[%s2610_s13 + $0x18] sm:$0xff]   ;;  %v2387_v14 = vld [vmem:[%s2610_s13 + $0x28] sm:$0xff]   ;;  %p2429_p13 = pnand %p2428_p12, %p2575_p4 }
  0x1e   : > { %2249 = vmatpush3.bf16.msra.mxu1 %v778_v4  ;;  %2215 = vmatpush3.bf16.msra.mxu0 %v1115_v9  ;;  %v2388_v15 = vld [vmem:[%s2610_s13 + $0x20] sm:$0xff]   ;;  %v2389_v16 = vld [vmem:[%s2610_s13 + $0x30] sm:$0xff]   ;;  %v2390_v17 = vld [vmem:[%s2610_s13 + $0x28] sm:$0xff]  }
  0x1f   : > { %2152 = vmatprep.mubr.msk.bf16.mxu1 %vm430_vm1, %v2383_v10  ;;  %2186 = vmatprep.mubr.msk.bf16.mxu0 %vm430_vm1, %v2384_v11  ;;  %v2391_v18 = vld [vmem:[%s2610_s13 + $0x38] sm:$0xff]   ;;  %v2392_v19 = vld [vmem:[%s2610_s13 + $0x30] sm:$0xff]   ;;  %v2393_v20 = vld [vmem:[%s2610_s13 + $0x40] sm:$0xff]   ;;  %p2430_p0 = pneg %p2429_p13 }
  0x20   : > { %v2394_v21 = vld [vmem:[%s2610_s13 + $0x38] sm:$0xff]   ;;  %v2395_v22 = vld [vmem:[%s2610_s13 + $0x48] sm:$0xff]   ;;  %v2396_v23 = vld [vmem:[%s2610_s13 + $0x10] sm:$0xff]  }
  0x21   : > { %v2397_v24 = vld [vmem:[%s2610_s13 + $0x50] sm:$0xff]   ;;  %v2398_v25 = vld [vmem:[%s2610_s13 + $0x18] sm:$0xff]   ;;  %v2400_v27 = vld [vmem:[%s2610_s13 + $0x20] sm:$0xff]  }
  0x22   : > { %v2399_v26 = vld [vmem:[%s2610_s13 + $0x58] sm:$0xff]   ;;  %v2401_v28 = vld [vmem:[%s2610_s13 + $0x60] sm:$0xff]   ;;  %v2402_v29 = vld [vmem:[%s2610_s13 + $0x28] sm:$0xff]  }
  0x23   : > { %v2403_v30 = vld [vmem:[%s2610_s13 + $0x68] sm:$0xff]   ;;  %v2404_v31 = vld [vmem:[%s2610_s13 + $0x30] sm:$0xff]   ;;  %v2406_v33 = vld [vmem:[%s2610_s13 + $0x38] sm:$0xff]  }
  0x24   : > { %v2405_v32 = vld [vmem:[%s2610_s13 + $0x70] sm:$0xff]   ;;  %v2407_v34 = vld [vmem:[%s2610_s13 + $0x78] sm:$0xff]   ;;  %v2408_v35 = vld [vmem:[%s2610_s13 + $0x40] sm:$0xff]  }
  0x25   : > { %2153 = vmatmul.mubr.msk.bf16.gmra.mrb[4].mxu1 %vm430_vm1, %v2385_v12  ;;  %2187 = vmatmul.mubr.msk.bf16.gmra.mrb[4].mxu0 %vm430_vm1, %v2386_v13  ;;  %v2409_v36 = vld [vmem:[%s2610_s13 + $0x80] sm:$0xff]   ;;  %v2410_v37 = vld [vmem:[%s2610_s13 + $0x48] sm:$0xff]   ;;  %v2412_v39 = vld [vmem:[%s2610_s13 + $0x50] sm:$0xff]  }
  0x26   : > { %2156 = vmatprep.mubr.msk.bf16.mxu1 %vm430_vm1, %v2387_v14  ;;  %2190 = vmatprep.mubr.msk.bf16.mxu0 %vm430_vm1, %v2388_v15  ;;  %v2411_v38 = vld [vmem:[%s2610_s13 + $0x40] sm:$0xff]   ;;  %v2413_v40 = vld [vmem:[%s2610_s13 + $0x48] sm:$0xff]   ;;  %v2414_v41 = vld [vmem:[%s2610_s13 + $0x58] sm:$0xff]  }
  0x27   : > { %v2415_v42 = vld [vmem:[%s2610_s13 + $0x50] sm:$0xff]   ;;  %v2416_v43 = vld [vmem:[%s2610_s13 + $0x60] sm:$0xff]   ;;  %v2417_v44 = vld [vmem:[%s2610_s13 + $0x58] sm:$0xff]  }
  0x28   : > { %v2418_v45 = vld [vmem:[%s2610_s13 + $0x68] sm:$0xff]   ;;  %v2419_v46 = vld [vmem:[%s2610_s13 + $0x60] sm:$0xff]   ;;  %v2420_v47 = vld [vmem:[%s2610_s13 + $0x70] sm:$0xff]  }
  0x29   : > { %v2421_v48 = vld [vmem:[%s2610_s13 + $0x68] sm:$0xff]   ;;  %v2422_v49 = vld [vmem:[%s2610_s13 + $0x78] sm:$0xff]   ;;  %v2423_v50 = vld [vmem:[%s2610_s13 + $0x70] sm:$0xff]  }
  0x2a   : > { %v2424_v51 = vld [vmem:[%s2610_s13 + $0x80] sm:$0xff]   ;;  %v2425_v52 = vld [vmem:[%s2610_s13 + $0x78] sm:$0xff]   ;;  %v2426_v53 = vld [vmem:[%s2610_s13 + $0x88] sm:$0xff]   ;;  %s2433_s13 = scalar_lea.vmem %s2432_s12, 4096 }
  0x2b   : > { %v2726_v7 = vld [vmem:[%s2884_s2] ss:$0 sm:$0xff]  ;;  %p2435_p2 = scmp.lt.s32.totalorder %s2433_s13, %s2427_s10 }
  0x2c   : > { %v2731_v10 = vld [vmem:[%s2885_s3] ss:$0 sm:$0xff] }
  0x2d   : > { %2157 = vmatmul.mubr.msk.bf16.gmra.mrb[8].mxu1 %vm430_vm1, %v2389_v16  ;;  %2191 = vmatmul.mubr.msk.bf16.gmra.mrb[8].mxu0 %vm430_vm1, %v2390_v17  ;;  %p2436_p3 = por %p2435_p2, %p2434_p1 }
  0x2e   : > { %2160 = vmatprep.mubr.msk.bf16.mxu1 %vm430_vm1, %v2391_v18  ;;  %2194 = vmatprep.mubr.msk.bf16.mxu0 %vm430_vm1, %v2392_v19 }
  0x2f   : > { %p2437_p5 = pnand %p2436_p3, %p2430_p0 }
  0x35   : > { %2161 = vmatmul.mubr.msk.bf16.gmra.mrb[12].mxu1 %vm430_vm1, %v2393_v20  ;;  %2195 = vmatmul.mubr.msk.bf16.gmra.mrb[12].mxu0 %vm430_vm1, %v2394_v21 }
  0x36   : > { %2164 = vmatprep.mubr.msk.bf16.mxu1 %vm430_vm1, %v2395_v22  ;;  %2216 = vmatprep.mubr.msk.bf16.mxu0 %vm430_vm1, %v2396_v23 }
  0x3d   : > { %2165 = vmatmul.mubr.msk.bf16.gmra.mrb[16].mxu1 %vm430_vm1, %v2397_v24  ;;  %2217 = vmatmul.mubr.msk.bf16.vlgmr.msra.gmra.mrb[0].mxu0 %vm430_vm1, %v2398_v25 }
  0x3e   : > { %2168 = vmatprep.mubr.msk.bf16.mxu1 %vm430_vm1, %v2399_v26  ;;  %2220 = vmatprep.mubr.msk.bf16.mxu0 %vm430_vm1, %v2400_v27 }
  0x45   : > { %2169 = vmatmul.mubr.msk.bf16.gmra.mrb[20].mxu1 %vm430_vm1, %v2401_v28  ;;  %2221 = vmatmul.mubr.msk.bf16.gmra.mrb[4].mxu0 %vm430_vm1, %v2402_v29 }
  0x46   : > { %2172 = vmatprep.mubr.msk.bf16.mxu1 %vm430_vm1, %v2403_v30  ;;  %2224 = vmatprep.mubr.msk.bf16.mxu0 %vm430_vm1, %v2404_v31 }
  0x4d   : > { %2173 = vmatmul.mubr.msk.bf16.gmra.mrb[24].mxu1 %vm430_vm1, %v2405_v32  ;;  %2225 = vmatmul.mubr.msk.bf16.gmra.mrb[8].mxu0 %vm430_vm1, %v2406_v33 }
  0x4e   : > { %2176 = vmatprep.mubr.msk.bf16.mxu1 %vm430_vm1, %v2407_v34  ;;  %2228 = vmatprep.mubr.msk.bf16.mxu0 %vm430_vm1, %v2408_v35 }
  0x55   : > { %2177 = vmatmul.mubr.msk.bf16.gmra.mrb[28].mxu1 %vm430_vm1, %v2409_v36  ;;  %2229 = vmatmul.mubr.msk.bf16.gmra.mrb[12].mxu0 %vm430_vm1, %v2410_v37 }
  0x56   : > { %2198 = vmatprep.mubr.msk.bf16.mxu1 %vm430_vm1, %v2411_v38  ;;  %2232 = vmatprep.mubr.msk.bf16.mxu0 %vm430_vm1, %v2412_v39 }
  0x5d   : > { %2199 = vmatmul.mubr.msk.bf16.vlgmr.msra.gmra.mrb[16].mxu1 %vm430_vm1, %v2413_v40  ;;  %2233 = vmatmul.mubr.msk.bf16.gmra.mrb[16].mxu0 %vm430_vm1, %v2414_v41 }
  0x5e   : > { %2202 = vmatprep.mubr.msk.bf16.mxu1 %vm430_vm1, %v2415_v42  ;;  %2236 = vmatprep.mubr.msk.bf16.mxu0 %vm430_vm1, %v2416_v43 }
  0x65   : > { %2203 = vmatmul.mubr.msk.bf16.gmra.mrb[20].mxu1 %vm430_vm1, %v2417_v44  ;;  %2237 = vmatmul.mubr.msk.bf16.gmra.mrb[20].mxu0 %vm430_vm1, %v2418_v45 }
  0x66   : > { %2206 = vmatprep.mubr.msk.bf16.mxu1 %vm430_vm1, %v2419_v46  ;;  %2240 = vmatprep.mubr.msk.bf16.mxu0 %vm430_vm1, %v2420_v47 }
  0x6d   : > { %2207 = vmatmul.mubr.msk.bf16.gmra.mrb[24].mxu1 %vm430_vm1, %v2421_v48  ;;  %2241 = vmatmul.mubr.msk.bf16.gmra.mrb[24].mxu0 %vm430_vm1, %v2422_v49 }
  0x6e   : > { %2210 = vmatprep.mubr.msk.bf16.mxu1 %vm430_vm1, %v2423_v50  ;;  %2244 = vmatprep.mubr.msk.bf16.mxu0 %vm430_vm1, %v2424_v51 }
  0x75   : > { %2211 = vmatmul.mubr.msk.bf16.gmra.mrb[28].mxu1 %vm430_vm1, %v2425_v52  ;;  %2245 = vmatmul.mubr.msk.bf16.gmra.mrb[28].mxu0 %vm430_vm1, %v2426_v53 }
  0xf0   : > { %v2150_v54 = vpop.f32.mrb[0].mxu1 }
  0xf1   : > { %v517_v55 = vpop.f32.mrb[1].mxu1 }
  0xf2   : > { %v2151_v56 = vpop.f32.mrb[2].mxu1 }
  0xf3   : > { %v520_v57 = vpop.f32.mrb[3].mxu1 }
  0xf8   : > { %v2154_v58 = vpop.f32.mrb[4].mxu1 }
  0xf9   : > { %v533_v59 = vpop.f32.mrb[5].mxu1 }
  0xfa   : > { %v2155_v60 = vpop.f32.mrb[6].mxu1 }
  0xfb   : > { %v536_v61 = vpop.f32.mrb[7].mxu1 }
 0x100   : > { %v2158_v62 = vpop.f32.mrb[8].mxu1 }
 0x101   : > { %v2709_v63 = vpop.f32.mrb[9].mxu1 }
 0x102   : > { %v2711_v0 = vpop.f32.mrb[10].mxu1 }
 0x103   : > { %v2713_v1 = vpop.f32.mrb[11].mxu1 }
 0x108   : > { %v2715_v2 = vpop.f32.mrb[12].mxu1 }
 0x109   : > { %v2717_v3 = vpop.f32.mrb[13].mxu1 }
 0x10a   : > { %v2719_v4 = vpop.f32.mrb[14].mxu1 }
 0x10b   : > { %v2721_v5 = vpop.f32.mrb[15].mxu1 }
 0x110   : > { %v2218_v6 = vpop.f32.mrb[0].mxu0 }
 0x111   : > { %v2250_v8 = vadd.f32 %v2218_v6, %v2150_v54  ;;  %v1151_v9 = vpop.f32.mrb[1].mxu0 }
 0x112   : > { %v2251_v11 = vadd.f32 %v1151_v9, %v517_v55  ;;  %v2219_v12 = vpop.f32.mrb[2].mxu0 }
 0x113   : > { %v1319_v13 = vmul.f32 %v2250_v8, %v2726_v7  ;;  %v2252_v14 = vadd.f32 %v2219_v12, %v2151_v56  ;;  %v1154_v15 = vpop.f32.mrb[3].mxu0 }
 0x114   : > { %v1317_v16 = vmul.f32 %v2251_v11, %v2726_v7  ;;  %v2253_v17 = vadd.f32 %v1154_v15, %v520_v57 }
 0x115   : > { %v1358_v18 = vadd.f32 %v2731_v10, %v1319_v13  ;;  %v1320_v19 = vmul.f32 %v2252_v14, %v2726_v7 }
 0x116   : > { %v1356_v20 = vadd.f32 %v2731_v10, %v1317_v16  ;;  %v1318_v21 = vmul.f32 %v2253_v17, %v2726_v7 }
 0x117   : > { %v1390_v22 = vmax.f32 %v1358_v18, 0.0  ;;  %v1359_v23 = vadd.f32 %v2731_v10, %v1320_v19 }
 0x118   : > { %v1388_v24 = vmax.f32 %v1356_v20, 0.0  ;;  %v1357_v25 = vadd.f32 %v2731_v10, %v1318_v21  ;;  %v2222_v26 = vpop.f32.mrb[4].mxu0 }
 0x119   : > { %v1391_v27 = vmax.f32 %v1359_v23, 0.0  ;;  %v2254_v28 = vadd.f32 %v2222_v26, %v2154_v58  ;;  %v1167_v29 = vpop.f32.mrb[5].mxu0  ;;  %v1422_v33 = vmin.f32 %v1390_v22, 6.0 }
 0x11a   : > { %v1389_v30 = vmax.f32 %v1357_v25, 0.0  ;;  %v2255_v31 = vadd.f32 %v1167_v29, %v533_v59  ;;  %v2223_v32 = vpop.f32.mrb[6].mxu0  ;;  %v1420_v38 = vmin.f32 %v1388_v24, 6.0 }
 0x11b   : > { %v1423_v34 = vmin.f32 %v1391_v27, 6.0  ;;  %v1323_v35 = vmul.f32 %v2254_v28, %v2726_v7  ;;  %v2256_v36 = vadd.f32 %v2223_v32, %v2155_v60  ;;  %v1170_v37 = vpop.f32.mrb[7].mxu0 }
 0x11c   : > { %v1421_v39 = vmin.f32 %v1389_v30, 6.0  ;;  %v1321_v40 = vmul.f32 %v2255_v31, %v2726_v7  ;;  %v2257_v41 = vadd.f32 %v1170_v37, %v536_v61 }
 0x11d   : > { %v2008_v42 = vpack.c.bf16 %v1423_v34, %v1422_v33  ;;  %v1362_v43 = vadd.f32 %v2731_v10, %v1323_v35  ;;  %v1324_v44 = vmul.f32 %v2256_v36, %v2726_v7 }
 0x11e   : > { %v2003_v45 = vpack.c.bf16 %v1421_v39, %v1420_v38  ;;  %v1360_v46 = vadd.f32 %v2731_v10, %v1321_v40  ;;  %v1322_v47 = vmul.f32 %v2257_v41, %v2726_v7 }
 0x11f   : > { %2080 = vst [vmem:[%s2750_s30 + $0x8] sm:$0xff] %v2008_v42   ;;  %v1394_v48 = vmax.f32 %v1362_v43, 0.0  ;;  %v1363_v49 = vadd.f32 %v2731_v10, %v1324_v44 }
 0x120   : > { %2004 = vst [vmem:[%s2750_s30] sm:$0xff] %v2003_v45   ;;  %v1392_v50 = vmax.f32 %v1360_v46, 0.0  ;;  %v1361_v51 = vadd.f32 %v2731_v10, %v1322_v47  ;;  %v2226_v52 = vpop.f32.mrb[8].mxu0 }
 0x121   : > { %v1395_v53 = vmax.f32 %v1363_v49, 0.0  ;;  %v2258_v54 = vadd.f32 %v2226_v52, %v2158_v62  ;;  %v1183_v55 = vpop.f32.mrb[9].mxu0  ;;  %v1426_v59 = vmin.f32 %v1394_v48, 6.0 }
 0x122   : > { %v1393_v56 = vmax.f32 %v1361_v51, 0.0  ;;  %v2259_v57 = vadd.f32 %v1183_v55, %v2709_v63  ;;  %v2227_v58 = vpop.f32.mrb[10].mxu0  ;;  %v1424_v9 = vmin.f32 %v1392_v50, 6.0 }
 0x123   : > { %v1427_v60 = vmin.f32 %v1395_v53, 6.0  ;;  %v1327_v61 = vmul.f32 %v2258_v54, %v2726_v7  ;;  %v2260_v6 = vadd.f32 %v2227_v58, %v2711_v0  ;;  %v1186_v8 = vpop.f32.mrb[11].mxu0 }
 0x124   : > { %v1425_v11 = vmin.f32 %v1393_v56, 6.0  ;;  %v1325_v12 = vmul.f32 %v2259_v57, %v2726_v7  ;;  %v2261_v62 = vadd.f32 %v1186_v8, %v2713_v1 }
 0x125   : > { %v2018_v13 = vpack.c.bf16 %v1427_v60, %v1426_v59  ;;  %v1366_v14 = vadd.f32 %v2731_v10, %v1327_v61  ;;  %v1328_v63 = vmul.f32 %v2260_v6, %v2726_v7 }
 0x126   : > { %v2013_v15 = vpack.c.bf16 %v1425_v11, %v1424_v9  ;;  %v1364_v16 = vadd.f32 %v2731_v10, %v1325_v12  ;;  %v1326_v17 = vmul.f32 %v2261_v62, %v2726_v7 }
 0x127   : > { %2082 = vst [vmem:[%s2750_s30 + $0x18] sm:$0xff] %v2018_v13   ;;  %v1398_v18 = vmax.f32 %v1366_v14, 0.0  ;;  %v1367_v0 = vadd.f32 %v2731_v10, %v1328_v63 }
 0x128   : > { %2081 = vst [vmem:[%s2750_s30 + $0x10] sm:$0xff] %v2013_v15   ;;  %v1396_v19 = vmax.f32 %v1364_v16, 0.0  ;;  %v1365_v20 = vadd.f32 %v2731_v10, %v1326_v17  ;;  %v2230_v21 = vpop.f32.mrb[12].mxu0 }
 0x129   : > { %v1399_v1 = vmax.f32 %v1367_v0, 0.0  ;;  %v2262_v22 = vadd.f32 %v2230_v21, %v2715_v2  ;;  %v1199_v23 = vpop.f32.mrb[13].mxu0  ;;  %v1430_v27 = vmin.f32 %v1398_v18, 6.0 }
 0x12a   : > { %v1397_v24 = vmax.f32 %v1365_v20, 0.0  ;;  %v2263_v25 = vadd.f32 %v1199_v23, %v2717_v3  ;;  %v2231_v26 = vpop.f32.mrb[14].mxu0  ;;  %v1428_v32 = vmin.f32 %v1396_v19, 6.0 }
 0x12b   : > { %v1431_v28 = vmin.f32 %v1399_v1, 6.0  ;;  %v1331_v29 = vmul.f32 %v2262_v22, %v2726_v7  ;;  %v2264_v30 = vadd.f32 %v2231_v26, %v2719_v4  ;;  %v1202_v31 = vpop.f32.mrb[15].mxu0 }
 0x12c   : > { %v1429_v33 = vmin.f32 %v1397_v24, 6.0  ;;  %v1329_v34 = vmul.f32 %v2263_v25, %v2726_v7  ;;  %v2265_v2 = vadd.f32 %v1202_v31, %v2721_v5 }
 0x12d   : > { %v2028_v35 = vpack.c.bf16 %v1431_v28, %v1430_v27  ;;  %v1370_v36 = vadd.f32 %v2731_v10, %v1331_v29  ;;  %v1332_v3 = vmul.f32 %v2264_v30, %v2726_v7 }
 0x12e   : > { %v2023_v37 = vpack.c.bf16 %v1429_v33, %v1428_v32  ;;  %v1368_v38 = vadd.f32 %v2731_v10, %v1329_v34  ;;  %v1330_v39 = vmul.f32 %v2265_v2, %v2726_v7 }
 0x12f   : > { %2084 = vst [vmem:[%s2750_s30 + $0x28] sm:$0xff] %v2028_v35   ;;  %v1402_v4 = vmax.f32 %v1370_v36, 0.0  ;;  %v1371_v40 = vadd.f32 %v2731_v10, %v1332_v3 }
 0x130   : > { %v2200_v41 = vpop.f32.mrb[16].mxu1  ;;  %2083 = vst [vmem:[%s2750_s30 + $0x20] sm:$0xff] %v2023_v37   ;;  %v1400_v42 = vmax.f32 %v1368_v38, 0.0  ;;  %v1369_v43 = vadd.f32 %v2731_v10, %v1330_v39  ;;  %v2234_v5 = vpop.f32.mrb[16].mxu0 }
 0x131   : > { %v878_v44 = vpop.f32.mrb[17].mxu1  ;;  %v1403_v45 = vmax.f32 %v1371_v40, 0.0  ;;  %v2266_v46 = vadd.f32 %v2234_v5, %v2200_v41  ;;  %v1215_v47 = vpop.f32.mrb[17].mxu0  ;;  %v1434_v53 = vmin.f32 %v1402_v4, 6.0 }
 0x132   : > { %v2201_v48 = vpop.f32.mrb[18].mxu1  ;;  %v1401_v49 = vmax.f32 %v1369_v43, 0.0  ;;  %v2267_v50 = vadd.f32 %v1215_v47, %v878_v44  ;;  %v2235_v51 = vpop.f32.mrb[18].mxu0  ;;  %v1432_v58 = vmin.f32 %v1400_v42, 6.0 }
 0x133   : > { %v881_v52 = vpop.f32.mrb[19].mxu1  ;;  %v1435_v54 = vmin.f32 %v1403_v45, 6.0  ;;  %v1335_v55 = vmul.f32 %v2266_v46, %v2726_v7  ;;  %v2268_v56 = vadd.f32 %v2235_v51, %v2201_v48  ;;  %v1218_v57 = vpop.f32.mrb[19].mxu0 }
 0x134   : > { %v1433_v59 = vmin.f32 %v1401_v49, 6.0  ;;  %v1333_v60 = vmul.f32 %v2267_v50, %v2726_v7  ;;  %v2269_v61 = vadd.f32 %v1218_v57, %v881_v52 }
 0x135   : > { %v2038_v6 = vpack.c.bf16 %v1435_v54, %v1434_v53  ;;  %v1374_v8 = vadd.f32 %v2731_v10, %v1335_v55  ;;  %v1336_v9 = vmul.f32 %v2268_v56, %v2726_v7 }
 0x136   : > { %v2033_v11 = vpack.c.bf16 %v1433_v59, %v1432_v58  ;;  %v1372_v12 = vadd.f32 %v2731_v10, %v1333_v60  ;;  %v1334_v62 = vmul.f32 %v2269_v61, %v2726_v7 }
 0x137   : > { %2086 = vst [vmem:[%s2750_s30 + $0x38] sm:$0xff] %v2038_v6   ;;  %v1406_v13 = vmax.f32 %v1374_v8, 0.0  ;;  %v1375_v14 = vadd.f32 %v2731_v10, %v1336_v9 }
 0x138   : > { %v2204_v63 = vpop.f32.mrb[20].mxu1  ;;  %2085 = vst [vmem:[%s2750_s30 + $0x30] sm:$0xff] %v2033_v11   ;;  %v1404_v15 = vmax.f32 %v1372_v12, 0.0  ;;  %v1373_v16 = vadd.f32 %v2731_v10, %v1334_v62  ;;  %v2238_v17 = vpop.f32.mrb[20].mxu0 }
 0x139   : > { %v894_v18 = vpop.f32.mrb[21].mxu1  ;;  %v1407_v0 = vmax.f32 %v1375_v14, 0.0  ;;  %v2270_v19 = vadd.f32 %v2238_v17, %v2204_v63  ;;  %v1231_v20 = vpop.f32.mrb[21].mxu0  ;;  %v1438_v25 = vmin.f32 %v1406_v13, 6.0 }
 0x13a   : > { %v2205_v21 = vpop.f32.mrb[22].mxu1  ;;  %v1405_v1 = vmax.f32 %v1373_v16, 0.0  ;;  %v2271_v22 = vadd.f32 %v1231_v20, %v894_v18  ;;  %v2239_v23 = vpop.f32.mrb[22].mxu0  ;;  %v1436_v30 = vmin.f32 %v1404_v15, 6.0 }
 0x13b   : > { %v897_v24 = vpop.f32.mrb[23].mxu1  ;;  %v1439_v26 = vmin.f32 %v1407_v0, 6.0  ;;  %v1339_v27 = vmul.f32 %v2270_v19, %v2726_v7  ;;  %v2272_v28 = vadd.f32 %v2239_v23, %v2205_v21  ;;  %v1234_v29 = vpop.f32.mrb[23].mxu0 }
 0x13c   : > { %v1437_v31 = vmin.f32 %v1405_v1, 6.0  ;;  %v1337_v32 = vmul.f32 %v2271_v22, %v2726_v7  ;;  %v2273_v33 = vadd.f32 %v1234_v29, %v897_v24 }
 0x13d   : > { %v2048_v34 = vpack.c.bf16 %v1439_v26, %v1438_v25  ;;  %v1378_v2 = vadd.f32 %v2731_v10, %v1339_v27  ;;  %v1340_v35 = vmul.f32 %v2272_v28, %v2726_v7 }
 0x13e   : > { %v2043_v36 = vpack.c.bf16 %v1437_v31, %v1436_v30  ;;  %v1376_v3 = vadd.f32 %v2731_v10, %v1337_v32  ;;  %v1338_v37 = vmul.f32 %v2273_v33, %v2726_v7 }
 0x13f   : > { %2088 = vst [vmem:[%s2750_s30 + $0x48] sm:$0xff] %v2048_v34   ;;  %v1410_v38 = vmax.f32 %v1378_v2, 0.0  ;;  %v1379_v39 = vadd.f32 %v2731_v10, %v1340_v35 }
 0x140   : > { %v2208_v4 = vpop.f32.mrb[24].mxu1  ;;  %2087 = vst [vmem:[%s2750_s30 + $0x40] sm:$0xff] %v2043_v36   ;;  %v1408_v40 = vmax.f32 %v1376_v3, 0.0  ;;  %v1377_v41 = vadd.f32 %v2731_v10, %v1338_v37  ;;  %v2242_v42 = vpop.f32.mrb[24].mxu0 }
 0x141   : > { %v910_v43 = vpop.f32.mrb[25].mxu1  ;;  %v1411_v5 = vmax.f32 %v1379_v39, 0.0  ;;  %v2274_v44 = vadd.f32 %v2242_v42, %v2208_v4  ;;  %v1247_v45 = vpop.f32.mrb[25].mxu0  ;;  %v1442_v51 = vmin.f32 %v1410_v38, 6.0 }
 0x142   : > { %v2209_v46 = vpop.f32.mrb[26].mxu1  ;;  %v1409_v47 = vmax.f32 %v1377_v41, 0.0  ;;  %v2275_v48 = vadd.f32 %v1247_v45, %v910_v43  ;;  %v2243_v49 = vpop.f32.mrb[26].mxu0  ;;  %v1440_v56 = vmin.f32 %v1408_v40, 6.0 }
 0x143   : > { %v913_v50 = vpop.f32.mrb[27].mxu1  ;;  %v1443_v52 = vmin.f32 %v1411_v5, 6.0  ;;  %v1343_v53 = vmul.f32 %v2274_v44, %v2726_v7  ;;  %v2276_v54 = vadd.f32 %v2243_v49, %v2209_v46  ;;  %v1250_v55 = vpop.f32.mrb[27].mxu0 }
 0x144   : > { %v1441_v57 = vmin.f32 %v1409_v47, 6.0  ;;  %v1341_v58 = vmul.f32 %v2275_v48, %v2726_v7  ;;  %v2277_v59 = vadd.f32 %v1250_v55, %v913_v50 }
 0x145   : > { %v2058_v60 = vpack.c.bf16 %v1443_v52, %v1442_v51  ;;  %v1382_v61 = vadd.f32 %v2731_v10, %v1343_v53  ;;  %v1344_v6 = vmul.f32 %v2276_v54, %v2726_v7 }
 0x146   : > { %v2053_v8 = vpack.c.bf16 %v1441_v57, %v1440_v56  ;;  %v1380_v9 = vadd.f32 %v2731_v10, %v1341_v58  ;;  %v1342_v11 = vmul.f32 %v2277_v59, %v2726_v7 }
 0x147   : > { %2090 = vst [vmem:[%s2750_s30 + $0x58] sm:$0xff] %v2058_v60   ;;  %v1414_v12 = vmax.f32 %v1382_v61, 0.0  ;;  %v1383_v62 = vadd.f32 %v2731_v10, %v1344_v6 }
 0x148   : > { %v2212_v13 = vpop.f32.mrb[28].mxu1  ;;  %2089 = vst [vmem:[%s2750_s30 + $0x50] sm:$0xff] %v2053_v8   ;;  %v1412_v14 = vmax.f32 %v1380_v9, 0.0  ;;  %v1381_v63 = vadd.f32 %v2731_v10, %v1342_v11  ;;  %v2246_v15 = vpop.f32.mrb[28].mxu0 }
 0x149   : > { %v926_v16 = vpop.f32.mrb[29].mxu1  ;;  %v1415_v17 = vmax.f32 %v1383_v62, 0.0  ;;  %v2278_v18 = vadd.f32 %v2246_v15, %v2212_v13  ;;  %v1263_v0 = vpop.f32.mrb[29].mxu0  ;;  %v1446_v23 = vmin.f32 %v1414_v12, 6.0 }
 0x14a   : > { %v2213_v19 = vpop.f32.mrb[30].mxu1  ;;  %v1413_v20 = vmax.f32 %v1381_v63, 0.0  ;;  %v2279_v21 = vadd.f32 %v1263_v0, %v926_v16  ;;  %v2247_v1 = vpop.f32.mrb[30].mxu0  ;;  %v1444_v28 = vmin.f32 %v1412_v14, 6.0 }
 0x14b   : > { %v929_v22 = vpop.f32.mrb[31].mxu1  ;;  %v1447_v24 = vmin.f32 %v1415_v17, 6.0  ;;  %v1347_v25 = vmul.f32 %v2278_v18, %v2726_v7  ;;  %v2280_v26 = vadd.f32 %v2247_v1, %v2213_v19  ;;  %v1266_v27 = vpop.f32.mrb[31].mxu0 }
 0x14c   : > { %v1445_v29 = vmin.f32 %v1413_v20, 6.0  ;;  %v1345_v30 = vmul.f32 %v2279_v21, %v2726_v7  ;;  %v2281_v31 = vadd.f32 %v1266_v27, %v929_v22 }
 0x14d   : > { %v2068_v32 = vpack.c.bf16 %v1447_v24, %v1446_v23  ;;  %v1386_v33 = vadd.f32 %v2731_v10, %v1347_v25  ;;  %v1348_v34 = vmul.f32 %v2280_v26, %v2726_v7 }
 0x14e   : > { %v2063_v2 = vpack.c.bf16 %v1445_v29, %v1444_v28  ;;  %v1384_v35 = vadd.f32 %v2731_v10, %v1345_v30  ;;  %v1346_v36 = vmul.f32 %v2281_v31, %v2726_v7 }
 0x14f   : > { %2092 = vst [vmem:[%s2750_s30 + $0x68] sm:$0xff] %v2068_v32   ;;  %v1418_v3 = vmax.f32 %v1386_v33, 0.0  ;;  %v1387_v37 = vadd.f32 %v2731_v10, %v1348_v34 }
 0x150   : > { %2091 = vst [vmem:[%s2750_s30 + $0x60] sm:$0xff] %v2063_v2   ;;  %v1416_v38 = vmax.f32 %v1384_v35, 0.0  ;;  %v1385_v39 = vadd.f32 %v2731_v10, %v1346_v36 }
 0x151   : > { %v1419_v4 = vmax.f32 %v1387_v37, 0.0  ;;  %v1450_v41 = vmin.f32 %v1418_v3, 6.0 }
 0x152   : > { %v1417_v40 = vmax.f32 %v1385_v39, 0.0  ;;  %v1448_v43 = vmin.f32 %v1416_v38, 6.0 }
 0x153   : > { %v1451_v42 = vmin.f32 %v1419_v4, 6.0 }
 0x154   : > { %v1449_v7 = vmin.f32 %v1417_v40, 6.0 }
 0x155   : > { %v2078_v5 = vpack.c.bf16 %v1451_v42, %v1450_v41 }
 0x156   : > { %v2073_v10 = vpack.c.bf16 %v1449_v7, %v1448_v43 }
 0x157   : > { %2094 = vst [vmem:[%s2750_s30 + $0x78] sm:$0xff] %v2078_v5  }
 0x158   : > { %2093 = vst [vmem:[%s2750_s30 + $0x70] sm:$0xff] %v2073_v10  }
 0x159   : > { %2440 = shalt.err (!%p2437_p5)
}
 0x15a   : > { %s2441_s14 = scalar_lea.hbm %s2828_s9, 2048  ;;  %s2445_s24 = scalar_lea.hbm %s2886_s4, 4096 }
 0x15b   : > { %p2442_p6 = scmp.ne.s32.totalorder %s2828_s9, %s2441_s14  ;;  %p2446_p10 = scmp.lt.u32.totalorder %s2828_s9, %s2886_s4 }
 0x15c   : > { %p2447_p11 = scmp.lt.u32.totalorder %s2445_s24, %s2441_s14  ;;  %p2449_p13 = scmp.lt.u32.totalorder %s2441_s14, %s2828_s9 }
 0x15d   : > { %p2443_p7 = pnand %p2442_p6, %p2575_p4 }
 0x15e   : > { %p2448_p12 = por %p2447_p11, %p2446_p10 }
 0x15f   : > { %p2444_p9 = pneg %p2443_p7 }
 0x160   : > { %p2450_p0 = por %p2449_p13, %p2448_p12 }
 0x162   : > { %p2451_p1 = pnand %p2450_p0, %p2444_p9 }
 0x164   : > { %2454 = shalt.err (!%p2451_p1)
}
 0x165   : > { %s2508_s30 = smov 64   ;;  %s2509_s5 = smov 4  }
 0x166   : > { %2319 = dma.vmem_to_hbm [thread:$0]  (%p2575_p4), %s2830_s6, 2048, %s2828_s9, %s2836_s18, %s2508_s30, %s2508_s30, %s2509_s5  }
 0x167 PF: > { %p2325_p2 = scmp.ge.s32.totalorder %s2505_s20, 2  ;;  %s1644_s7 = sand.u32 1, %s2485_s15  }
 0x168   : > { %s1645_s8 = scalar_lea.sflag [#allocation3], %s1644_s7 }
 0x169   : > { %p2322_p3 = pnand %p2325_p2, %p2582_p8 }
 0x16b   : > { %2480 = dma.done.wait (!%p2322_p3), %s1645_s8, 2048  }
 0x16c   : > { %2482 = vsyncadd (!%p2322_p3), %s1645_s8, 4294965248  ;;  %s17_s20 = sadd.s32 1, %s2505_s20   ;;  %s2889_s15 = smov %s2489_s16 }
 0x16d   : > { %p14_p5 = scmp.ge.s32.totalorder %s17_s20, 4   ;;  %s2890_s16 = smov %s2493_s17 }
 0x16e   : > { %s2891_s17 = smov %s2588_s28  ;;  %s2892_s18 = smov %s2501_s19 }
 0x16f   : > { %s2893_s19 = smov %s2895_s23  ;;  %16 = sbr.rel (!%p14_p5) target bundleno = 4 (0x4), region = 85 }
 0x176   :  { %1650 = vsyncpa [#allocation3], 1 }
 0x177   :  { %1652 = vsyncpa [#allocation3 + $0x1], 1 }

</bundles_post_ra>
